<compile_context>
chip_gen: v5e
topology: v5e:2x2
jax: 0.10.0
libtpu: 0.0.40
codegen_flags: <defaults>
</compile_context>

<pallas_src>
import functools

import jax
import jax.numpy as jnp
from jax.experimental import pallas as pl
from jax.experimental.pallas import tpu as pltpu


def _round_up(x: int, m: int) -> int:
    return ((x + m - 1) // m) * m


def _equinorm_kernel_simple(x_ref, o_ref, *, inv_c: float):
    """One (TM, D) block; each lane row is a single (b, n) row."""
    xf = x_ref[...].astype(jnp.float32)
    ns = jnp.sum(xf * xf, axis=-1, keepdims=True) * inv_c
    o_ref[...] = (xf * jax.lax.rsqrt(ns)).astype(o_ref.dtype)


def _equinorm_kernel_packed(seg_ref, x_ref, o_ref, *, inv_c: float):
    """One (TM, 128) block holding n_seg independent (b, n) rows per lane row.

    Per-segment sum + broadcast-back is a single block-diagonal matmul on the
    (otherwise idle) MXU, keeping the VPU/XLU free so the kernel stays
    HBM-bandwidth-bound.  HIGHEST precision keeps the f32 sums exact-ish.
    """
    xf = x_ref[...].astype(jnp.float32)
    sq = xf * xf
    seg_sum = jnp.dot(sq, seg_ref[...],
                      preferred_element_type=jnp.float32,
                      precision=jax.lax.Precision.HIGHEST)
    o_ref[...] = (xf * jax.lax.rsqrt(seg_sum * inv_c)).astype(o_ref.dtype)


def equi_norm_layer(x: jax.Array) -> jax.Array:
    """x: (B, N, C, K). Returns x / sqrt(mean_C(sum_K x^2)) broadcast over (C, K)."""
    B, N, C, K = x.shape
    M, D = B * N, C * K
    itemsize = jnp.dtype(x.dtype).itemsize
    inv_c = 1.0 / C

    x_flat = x.reshape(M, D)

    # Pack several (b, n) rows into one 128-lane kernel row when D divides 128,
    # so every store is an unmasked full-width vst.
    if D < 128 and 128 % D == 0:
        n_seg = 128 // D
    else:
        n_seg = 1

    # Pad rows (with ones -> finite norms) up to a multiple of n_seg instead of
    # falling back to narrow masked stores; padded rows are sliced off after.
    pad_rows = (-M) % n_seg
    if pad_rows:
        x_flat = jnp.concatenate(
            [x_flat, jnp.ones((pad_rows, D), x.dtype)], axis=0)
    Mp = M + pad_rows

    W = n_seg * D
    M2 = Mp // n_seg
    x2 = x_flat.reshape(M2, W)

    # Row tile from a VMEM byte budget: 4 double-buffered (in + out) tiles of
    # ~2 MiB each (8 MiB total) -> safe under every generation's scoped VMEM
    # default while being large enough to hit the HBM roofline.
    budget_bytes = 8 << 20
    TM = max(8, (budget_bytes // (4 * W * itemsize)) // 8 * 8)
    TM = min(TM, _round_up(M2, 8))
    # v7x megacore: keep the grid >= 2 "parallel" steps when there is enough
    # work so both TensorCores (and both halves of the HBM path) are used.
    if M2 >= 16:
        TM = min(TM, _round_up(-(-M2 // 2), 8))

    grid = (pl.cdiv(M2, TM),)
    cost = pl.CostEstimate(flops=3 * M * D,
                           transcendentals=M,
                           bytes_accessed=2 * M * D * itemsize)
    row_spec = pl.BlockSpec((TM, W), lambda i: (i, 0))

    if n_seg > 1:
        # Block-diagonal ones matrix: (sq @ seg_mat)[r, j] = per-segment sum of
        # the segment containing lane j.  Constant block index -> stays
        # VMEM-resident across grid steps.
        lane = jnp.arange(W, dtype=jnp.int32)
        seg_mat = (lane[:, None] // D == lane[None, :] // D).astype(jnp.float32)
        out2 = pl.pallas_call(
            functools.partial(_equinorm_kernel_packed, inv_c=inv_c),
            out_shape=jax.ShapeDtypeStruct((M2, W), x.dtype),
            grid=grid,
            in_specs=[pl.BlockSpec((W, W), lambda i: (0, 0)), row_spec],
            out_specs=row_spec,
            compiler_params=pltpu.CompilerParams(
                dimension_semantics=("parallel",)),
            cost_estimate=cost,
        )(seg_mat, x2)
    else:
        out2 = pl.pallas_call(
            functools.partial(_equinorm_kernel_simple, inv_c=inv_c),
            out_shape=jax.ShapeDtypeStruct((M2, W), x.dtype),
            grid=grid,
            in_specs=[row_spec],
            out_specs=row_spec,
            compiler_params=pltpu.CompilerParams(
                dimension_semantics=("parallel",)),
            cost_estimate=cost,
        )(x2)

    out_flat = out2.reshape(Mp, D)
    if pad_rows:
        out_flat = out_flat[:M]
    return out_flat.reshape(B, N, C, K)


def _reference(x: jax.Array) -> jax.Array:
    # Pure-JAX mirror of the PyTorch forward (Euclidean reverse inner product).
    x32 = x.astype(jnp.float32)
    ip = jnp.sum(x32 * x32, axis=-1)                 # inner_product_through_reverse(x, x)
    ns = jnp.mean(ip, axis=-1, keepdims=True)        # mean over channels, keepdim
    ns = ns.reshape(x.shape[0], x.shape[1], 1, 1)    # .view(B, N, 1, 1)
    return (x32 / jnp.sqrt(ns)).astype(x.dtype)


if __name__ == "__main__":
    # Small shapes consistent with the module's 4-D input:
    # batch=2, dim1(seq/spatial)=8, channels=4, blades=16 (e.g. 4D GA -> 16 blades).
    B, N, C, K = 2, 8, 4, 16
    key = jax.random.PRNGKey(0)
    x = jax.random.normal(key, (B, N, C, K), dtype=jnp.float32)

    out = equi_norm_layer(x)
    out = jax.block_until_ready(out)

    ref = _reference(x)
    assert out.shape == x.shape and out.dtype == x.dtype
    assert jnp.allclose(out, ref, atol=1e-5, rtol=1e-5), "mismatch vs reference"

    print("KERNEL_OK")
</pallas_src>

<mosaic_0001>
module attributes {stable_mosaic.version = 11 : i64} {
  func.func @_equinorm_kernel_packed(%arg0: i32, %arg1: memref<128x128xf32, #tpu.memory_space<vmem>>, %arg2: memref<8x128xf32, #tpu.memory_space<vmem>>, %arg3: memref<8x128xf32, #tpu.memory_space<vmem>>) attributes {dimension_semantics = [#tpu.dimension_semantics<parallel>], iteration_bounds = array<i64: 1>, scalar_prefetch = 0 : i64, scratch_operands = 0 : i64, tpu.core_type = #tpu.core_type<tc>, window_params = [{pipeline_mode = #tpu.pipeline_mode<synchronous>, transform_indices = @transform_0, window_bounds = array<i64: 128, 128>}, {transform_indices = @transform_1, window_bounds = array<i64: 8, 128>}, {transform_indices = @transform_2, window_bounds = array<i64: 8, 128>}]} {
    %c0 = arith.constant 0 : index
    %c0_0 = arith.constant 0 : index
    %0 = vector.load %arg2[%c0, %c0_0] : memref<8x128xf32, #tpu.memory_space<vmem>>, vector<8x128xf32>
    %1 = arith.mulf %0, %0 : vector<8x128xf32>
    %c0_1 = arith.constant 0 : index
    %c0_2 = arith.constant 0 : index
    %2 = vector.load %arg1[%c0_1, %c0_2] : memref<128x128xf32, #tpu.memory_space<vmem>>, vector<128x128xf32>
    %cst = arith.constant dense<0.000000e+00> : vector<8x128xf32>
    %3 = tpu.matmul %1, %2, %cst {dimension_numbers = #tpu.dot_dimension_numbers<[1], [0], [0], [1], [0, 0, 1, 1], [], []>, precision = #tpu.contract_precision<fp32>} : vector<8x128xf32>, vector<128x128xf32>, vector<8x128xf32> -> vector<8x128xf32>
    %cst_3 = arith.constant 2.500000e-01 : f32
    %4 = vector.broadcast %cst_3 : f32 to vector<8x128xf32>
    %5 = arith.mulf %3, %4 : vector<8x128xf32>
    %6 = math.rsqrt %5 : vector<8x128xf32>
    %7 = arith.mulf %0, %6 : vector<8x128xf32>
    %c0_4 = arith.constant 0 : index
    %c0_5 = arith.constant 0 : index
    %8 = vector.load %arg3[%c0_4, %c0_5] : memref<8x128xf32, #tpu.memory_space<vmem>>, vector<8x128xf32>
    tpu.vector_store %arg3[%c0_4, %c0_5], %7 {strides = array<i32>} : memref<8x128xf32, #tpu.memory_space<vmem>>, vector<8x128xf32>,
    return
  }
  func.func @transform_0(%arg0: i32) -> (i32, i32) {
    %c0_i32 = arith.constant 0 : i32
    %c0_i32_0 = arith.constant 0 : i32
    %c0_i32_1 = arith.constant 0 : i32
    return %c0_i32, %c0_i32_0 : i32, i32
  }
  func.func @transform_1(%arg0: i32) -> (i32, i32) {
    %c0_i32 = arith.constant 0 : i32
    %c0_i32_0 = arith.constant 0 : i32
    return %arg0, %c0_i32 : i32, i32
  }
  func.func @transform_2(%arg0: i32) -> (i32, i32) {
    %c0_i32 = arith.constant 0 : i32
    %c0_i32_0 = arith.constant 0 : i32
    return %arg0, %c0_i32 : i32, i32
  }
}

</mosaic_0001>

<bundles_post_ra>
// kernel: tpu_custom_call.1
= control target key start
LH: loop header
LB: loop body
LE: loop exit
PB: predicated region body
PF: predicated region fallthrough
CT: control target
= control target key end

     0   :  { %7 = vsyncpa [#allocation3], 0  ;;  %s789_s0 = inlined_call_operand.hbm [shape: f32[128,128], index: 0, kind: input, shape index: {}]   ;;  %s790_s1 = inlined_call_operand.hbm [shape: f32[8,128], index: 1, kind: input, shape index: {}]   ;;  %s791_s2 = inlined_call_operand.hbm [shape: f32[8,128], index: 2, kind: output, shape index: {}]  }
   0x1   :  { %8 = vsyncpa [#allocation6], 0 }
   0x2   :  { %9 = vsyncpa [#allocation4], 0  ;;  %s14_s11 = sshll.u32 %s789_s0, 4  ;;  %s517_s12 = smov [#allocation2]   ;;  %s15_s11 = int_to_ptr.hbm [resolvable:$true] %s14_s11 }
   0x3   :  { %s16_s13 = sshll.u32 %s517_s12, 4  ;;  %s28_s16 = sshll.u32 %s790_s1, 4  ;;  %s17_s13 = int_to_ptr.vmem [resolvable:$true] %s16_s13  ;;  %s29_s16 = int_to_ptr.hbm [resolvable:$true] %s28_s16 }
   0x4   :  { %s518_s17 = smov 128   ;;  %s519_s18 = smov 8  }
   0x5   :  { %22 = dma.hbm_to_vmem [thread:$0]  %s15_s11, 2048, %s17_s13, [#allocation3], %s518_s17, %s518_s17, %s519_s18  }
   0x6   :  { %s520_s19 = smov [#allocation5]  }
   0x7   :  { %s30_s20 = sshll.u32 %s520_s19, 4  ;;  %s31_s20 = int_to_ptr.vmem [resolvable:$true] %s30_s20 }
   0x8   :  { %33 = dma.hbm_to_vmem [thread:$0]  %s29_s16, 128, %s31_s20, [#allocation6]  }
   0x9   :  { %511 = dma.done.wait [#allocation3], 2048  }
   0xa   :  { %512 = vsyncadd [#allocation3], 4294965248 }
   0xb   :  { %513 = dma.done.wait [#allocation6], 128  }
   0xc   :  { %514 = vsyncadd [#allocation6], 4294967168  ;;  %v59_v0 = vld [vmem:[#allocation2 + $0x78] sm:$0xff]  ;;  %v58_v1 = vld [vmem:[#allocation2 + $0x70] sm:$0xff]  ;;  %s521_s0 = smov [#allocation7]   ;;  %s421_s23 = sshll.u32 %s791_s2, 4  ;;  %s422_s23 = int_to_ptr.hbm [resolvable:$true] %s421_s23 }
   0xd   :  { %v57_v2 = vld [vmem:[#allocation2 + $0x68] sm:$0xff]  ;;  %v543_v3 = vand.u32 4294901760, %v59_v0  ;;  %v545_v4 = vand.u32 4294901760, %v58_v1  ;;  %v56_v6 = vld [vmem:[#allocation2 + $0x60] sm:$0xff]  ;;  %v55_v7 = vld [vmem:[#allocation2 + $0x58] sm:$0xff]  ;;  %s419_s1 = sshll.u32 %s521_s0, 4  ;;  %s420_s1 = int_to_ptr.vmem [resolvable:$true] %s419_s1 }
   0xe   :  { %v547_v5 = vand.u32 4294901760, %v57_v2  ;;  %v54_v8 = vld [vmem:[#allocation2 + $0x50] sm:$0xff]  ;;  %v549_v9 = vand.u32 4294901760, %v56_v6  ;;  %v551_v10 = vand.u32 4294901760, %v55_v7  ;;  %v53_v12 = vld [vmem:[#allocation2 + $0x48] sm:$0xff]  ;;  %v52_v13 = vld [vmem:[#allocation2 + $0x40] sm:$0xff] }
   0xf   :  { %v553_v11 = vand.u32 4294901760, %v54_v8  ;;  %61 = vmatpush.msra.mxu0 %v543_v3  ;;  %v557_v14 = vsub.f32 %v59_v0, %v543_v3  ;;  %v560_v15 = vsub.f32 %v58_v1, %v545_v4  ;;  %v565_v17 = vand.u32 4294901760, %v53_v12  ;;  %v51_v18 = vld [vmem:[#allocation2 + $0x38] sm:$0xff]  ;;  %257 = vmatpush.msra.mxu3 %v543_v3  ;;  %v50_v26 = vld [vmem:[#allocation2 + $0x30] sm:$0xff]  ;;  %v49_v36 = vld [vmem:[#allocation2 + $0x28] sm:$0xff] }
  0x10   :  { %v563_v16 = vsub.f32 %v57_v2, %v547_v5  ;;  %v569_v19 = vsub.f32 %v56_v6, %v549_v9  ;;  %v572_v20 = vsub.f32 %v55_v7, %v551_v10  ;;  %v581_v25 = vand.u32 4294901760, %v52_v13  ;;  %v48_v42 = vld [vmem:[#allocation2 + $0x20] sm:$0xff]  ;;  %v47_v47 = vld [vmem:[#allocation2 + $0x18] sm:$0xff]  ;;  %v46_v55 = vld [vmem:[#allocation2 + $0x10] sm:$0xff] }
  0x11   :  { %v575_v21 = vsub.f32 %v54_v8, %v553_v11  ;;  %63 = vmatpush.msra.mxu0 %v545_v4  ;;  %v103_v22 = vand.u32 4294901760, %v557_v14  ;;  %v109_v23 = vand.u32 4294901760, %v560_v15  ;;  %204 = vmatpush.msra.mxu2 %v557_v14  ;;  %v585_v28 = vand.u32 4294901760, %v51_v18  ;;  %v45_v60 = vld [vmem:[#allocation2 + $0x8] sm:$0xff]  ;;  %v655_v61 = vld [vmem:[#allocation5] sm:$0xff] }
  0x12   :  { %v115_v24 = vand.u32 4294901760, %v563_v16  ;;  %v121_v27 = vand.u32 4294901760, %v569_v19  ;;  %v588_v29 = vsub.f32 %v53_v12, %v565_v17  ;;  %259 = vmatpush.msra.mxu3 %v545_v4  ;;  %v127_v33 = vand.u32 4294901760, %v572_v20  ;;  %v44_v2 = vld [vmem:[#allocation2] sm:$0xff] }
  0x13   :  { %65 = vmatpush.msra.mxu0 %v547_v5  ;;  %v104_v30 = vsub.f32 %v557_v14, %v103_v22  ;;  %v110_v31 = vsub.f32 %v560_v15, %v109_v23  ;;  %207 = vmatpush.msra.mxu2 %v560_v15  ;;  %v133_v34 = vand.u32 4294901760, %v575_v21  ;;  %v604_v35 = vand.u32 4294901760, %v50_v26 }
  0x14   :  { %v116_v32 = vsub.f32 %v563_v16, %v115_v24  ;;  %261 = vmatpush.msra.mxu3 %v547_v5  ;;  %v122_v39 = vsub.f32 %v569_v19, %v121_v27  ;;  %v612_v40 = vsub.f32 %v52_v13, %v581_v25  ;;  %v139_v41 = vand.u32 4294901760, %v588_v29 }
  0x15   :  { %v105_v37 = vand.u32 4294901760, %v104_v30  ;;  %67 = vmatpush.msra.mxu0 %v549_v9  ;;  %v111_v38 = vand.u32 4294901760, %v110_v31  ;;  %210 = vmatpush.msra.mxu2 %v563_v16  ;;  %v128_v44 = vsub.f32 %v572_v20, %v127_v33  ;;  %v621_v45 = vand.u32 4294901760, %v49_v36 }
  0x16   :  { %263 = vmatpush.msra.mxu3 %v549_v9  ;;  %v117_v43 = vand.u32 4294901760, %v116_v32  ;;  %v624_v46 = vsub.f32 %v51_v18, %v585_v28  ;;  %v145_v48 = vand.u32 4294901760, %v612_v40  ;;  %v123_v49 = vand.u32 4294901760, %v122_v39 }
  0x17   :  { %106 = vmatpush.msra.mxu1 %v105_v37  ;;  %69 = vmatpush.msra.mxu0 %v551_v10  ;;  %v134_v50 = vsub.f32 %v575_v21, %v133_v34  ;;  %v633_v51 = vand.u32 4294901760, %v48_v42  ;;  %v636_v52 = vsub.f32 %v50_v26, %v604_v35  ;;  %v140_v53 = vsub.f32 %v588_v29, %v139_v41 }
  0x18   :  { %213 = vmatpush.msra.mxu2 %v569_v19  ;;  %265 = vmatpush.msra.mxu3 %v551_v10  ;;  %v641_v54 = vand.u32 4294901760, %v47_v47  ;;  %v129_v56 = vand.u32 4294901760, %v128_v44  ;;  %v151_v57 = vand.u32 4294901760, %v624_v46  ;;  %v648_v58 = vsub.f32 %v49_v36, %v621_v45 }
  0x19   :  { %112 = vmatpush.msra.mxu1 %v111_v38  ;;  %71 = vmatpush.msra.mxu0 %v553_v11  ;;  %v146_v59 = vsub.f32 %v612_v40, %v145_v48  ;;  %v135_v62 = vand.u32 4294901760, %v134_v50  ;;  %v157_v63 = vand.u32 4294901760, %v636_v52  ;;  %v659_v0 = vand.u32 4294901760, %v46_v55 }
  0x1a   :  { %216 = vmatpush.msra.mxu2 %v572_v20  ;;  %267 = vmatpush.msra.mxu3 %v553_v11  ;;  %v662_v1 = vsub.f32 %v48_v42, %v633_v51  ;;  %v141_v6 = vand.u32 4294901760, %v140_v53  ;;  %v665_v7 = vsub.f32 %v47_v47, %v641_v54  ;;  %v152_v8 = vsub.f32 %v624_v46, %v151_v57 }
  0x1b   :  { %118 = vmatpush.msra.mxu1 %v117_v43  ;;  %73 = vmatpush.msra.mxu0 %v565_v17  ;;  %v163_v12 = vand.u32 4294901760, %v648_v58  ;;  %v674_v13 = vand.u32 4294901760, %v45_v60  ;;  %v43_v18 = vmul.f32 %v655_v61, %v655_v61  ;;  %v147_v26 = vand.u32 4294901760, %v146_v59 }
  0x1c   :  { %219 = vmatpush.msra.mxu2 %v575_v21  ;;  %269 = vmatpush.msra.mxu3 %v565_v17  ;;  %v678_v30 = vand.u32 4294901760, %v44_v2  ;;  %v158_v31 = vsub.f32 %v636_v52, %v157_v63  ;;  %v169_v32 = vand.u32 4294901760, %v662_v1  ;;  %v688_v36 = vsub.f32 %v46_v55, %v659_v0 }
  0x1d   :  { %124 = vmatpush.msra.mxu1 %v123_v49  ;;  %75 = vmatpush.msra.mxu0 %v581_v25  ;;  %v690_v37 = vand.u32 4294901760, %v43_v18  ;;  %v175_v38 = vand.u32 4294901760, %v665_v7  ;;  %v153_v39 = vand.u32 4294901760, %v152_v8  ;;  %v164_v42 = vsub.f32 %v648_v58, %v163_v12 }
  0x1e   :  { %222 = vmatpush.msra.mxu2 %v588_v29  ;;  %271 = vmatpush.msra.mxu3 %v581_v25  ;;  %v700_v43 = vsub.f32 %v45_v60, %v674_v13  ;;  %v159_v47 = vand.u32 4294901760, %v158_v31  ;;  %v170_v49 = vsub.f32 %v662_v1, %v169_v32  ;;  %v181_v50 = vand.u32 4294901760, %v688_v36 }
  0x1f   :  { %130 = vmatpush.msra.mxu1 %v129_v56  ;;  %77 = vmatpush.msra.mxu0 %v585_v28  ;;  %v93_v44 = vsub.f32 %v43_v18, %v690_v37  ;;  %v711_v53 = vsub.f32 %v44_v2, %v678_v30  ;;  %v165_v55 = vand.u32 4294901760, %v164_v42  ;;  %v176_v56 = vsub.f32 %v665_v7, %v175_v38 }
  0x20   :  { %225 = vmatpush.msra.mxu2 %v612_v40  ;;  %273 = vmatpush.msra.mxu3 %v585_v28  ;;  %v187_v59 = vand.u32 4294901760, %v700_v43  ;;  %v182_v2 = vsub.f32 %v688_v36, %v181_v50 }
  0x21   :  { %136 = vmatpush.msra.mxu1 %v135_v62  ;;  %79 = vmatpush.msra.mxu0 %v604_v35  ;;  %v94_v60 = vand.u32 4294901760, %v93_v44  ;;  %v171_v62 = vand.u32 4294901760, %v170_v49  ;;  %v177_v8 = vand.u32 4294901760, %v176_v56 }
  0x22   :  { %228 = vmatpush.msra.mxu2 %v624_v46  ;;  %275 = vmatpush.msra.mxu3 %v604_v35  ;;  %v188_v18 = vsub.f32 %v700_v43, %v187_v59  ;;  %v183_v31 = vand.u32 4294901760, %v182_v2 }
  0x23   :  { %142 = vmatpush.msra.mxu1 %v141_v6  ;;  %81 = vmatpush.msra.mxu0 %v621_v45  ;;  %v193_v6 = vand.u32 4294901760, %v711_v53 }
  0x24   :  { %231 = vmatpush.msra.mxu2 %v636_v52  ;;  %277 = vmatpush.msra.mxu3 %v621_v45  ;;  %v189_v42 = vand.u32 4294901760, %v188_v18 }
  0x25   :  { %148 = vmatpush.msra.mxu1 %v147_v26  ;;  %83 = vmatpush.msra.mxu0 %v633_v51  ;;  %v95_v26 = vsub.f32 %v93_v44, %v94_v60 }
  0x26   :  { %234 = vmatpush.msra.mxu2 %v648_v58  ;;  %279 = vmatpush.msra.mxu3 %v633_v51 }
  0x27   :  { %154 = vmatpush.msra.mxu1 %v153_v39  ;;  %85 = vmatpush.msra.mxu0 %v641_v54  ;;  %v194_v39 = vsub.f32 %v711_v53, %v193_v6 }
  0x28   :  { %237 = vmatpush.msra.mxu2 %v662_v1  ;;  %281 = vmatpush.msra.mxu3 %v641_v54 }
  0x29   :  { %160 = vmatpush.msra.mxu1 %v159_v47  ;;  %87 = vmatpush.msra.mxu0 %v659_v0  ;;  %v96_v47 = vand.u32 4294901760, %v95_v26  ;;  %v195_v49 = vand.u32 4294901760, %v194_v39 }
  0x2a   :  { %240 = vmatpush.msra.mxu2 %v665_v7  ;;  %283 = vmatpush.msra.mxu3 %v659_v0 }
  0x2b   :  { %166 = vmatpush.msra.mxu1 %v165_v55  ;;  %89 = vmatpush.msra.mxu0 %v674_v13 }
  0x2c   :  { %243 = vmatpush.msra.mxu2 %v688_v36  ;;  %285 = vmatpush.msra.mxu3 %v674_v13 }
  0x2d   :  { %172 = vmatpush.msra.mxu1 %v171_v62  ;;  %91 = vmatpush.msra.mxu0 %v678_v30 }
  0x2e   :  { %246 = vmatpush.msra.mxu2 %v700_v43  ;;  %287 = vmatpush.msra.mxu3 %v678_v30 }
  0x2f   :  { %298 = vmatpush.msrb.mxu0 %v103_v22  ;;  %178 = vmatpush.msra.mxu1 %v177_v8 }
  0x30   :  { %249 = vmatpush.msra.mxu2 %v711_v53  ;;  %291 = vmatmul.f32.vlgmr.msra.gmra.mxu3 %v94_v60 }
  0x31   :  { %302 = vmatpush.msrb.mxu0 %v109_v23  ;;  %184 = vmatpush.msra.mxu1 %v183_v31 }
  0x32   :  { %252 = vmatmul.f32.vlgmr.msra.gmra.mxu2 %v93_v44  ;;  %97 = vmatmul.f32.vlgmr.msra.gmra.mxu0 %v96_v47 }
  0x33   :  { %306 = vmatpush.msrb.mxu0 %v115_v24  ;;  %190 = vmatpush.msra.mxu1 %v189_v42 }
  0x35   :  { %310 = vmatpush.msrb.mxu0 %v121_v27  ;;  %196 = vmatpush.msra.mxu1 %v195_v49 }
  0x36   :  { %198 = vmatmul.f32.vlgmr.msra.gmra.mxu1 %v690_v37 }
  0x37   :  { %365 = vmatpush.msrb.mxu1 %v543_v3  ;;  %314 = vmatpush.msrb.mxu0 %v127_v33 }
  0x39   :  { %367 = vmatpush.msrb.mxu1 %v545_v4  ;;  %318 = vmatpush.msrb.mxu0 %v133_v34 }
  0x3b   :  { %369 = vmatpush.msrb.mxu1 %v547_v5  ;;  %322 = vmatpush.msrb.mxu0 %v139_v41 }
  0x3d   :  { %371 = vmatpush.msrb.mxu1 %v549_v9  ;;  %326 = vmatpush.msrb.mxu0 %v145_v48 }
  0x3f   :  { %373 = vmatpush.msrb.mxu1 %v551_v10  ;;  %330 = vmatpush.msrb.mxu0 %v151_v57 }
  0x41   :  { %375 = vmatpush.msrb.mxu1 %v553_v11  ;;  %334 = vmatpush.msrb.mxu0 %v157_v63 }
  0x43   :  { %377 = vmatpush.msrb.mxu1 %v565_v17  ;;  %338 = vmatpush.msrb.mxu0 %v163_v12 }
  0x45   :  { %379 = vmatpush.msrb.mxu1 %v581_v25  ;;  %342 = vmatpush.msrb.mxu0 %v169_v32 }
  0x47   :  { %381 = vmatpush.msrb.mxu1 %v585_v28  ;;  %346 = vmatpush.msrb.mxu0 %v175_v38 }
  0x49   :  { %383 = vmatpush.msrb.mxu1 %v604_v35  ;;  %350 = vmatpush.msrb.mxu0 %v181_v50 }
  0x4b   :  { %385 = vmatpush.msrb.mxu1 %v621_v45  ;;  %354 = vmatpush.msrb.mxu0 %v187_v59 }
  0x4d   :  { %387 = vmatpush.msrb.mxu1 %v633_v51  ;;  %358 = vmatpush.msrb.mxu0 %v193_v6 }
  0x4e   :  { %360 = vmatmul.f32.vlgmr.msrb.gmra.mxu0 %v690_v37 }
  0x4f   :  { %389 = vmatpush.msrb.mxu1 %v641_v54 }
  0x51   :  { %391 = vmatpush.msrb.mxu1 %v659_v0 }
  0x53   :  { %393 = vmatpush.msrb.mxu1 %v674_v13 }
  0x55   :  { %395 = vmatpush.msrb.mxu1 %v678_v30 }
  0x56   :  { %397 = vmatmul.f32.vlgmr.msrb.gmra.mxu1 %v690_v37 }
  0xaf   :  { %v98_v4 = vpop.f32.mrf.mxu0 }
  0xb3   :  { %v199_v3 = vpop.f32.mrf.mxu1  ;;  %v292_v11 = vpop.f32.mrf.mxu3 }
  0xb4   :  { %v200_v5 = vadd.f32 %v199_v3, %v98_v4 }
  0xb5   :  { %v253_v9 = vpop.f32.mrf.mxu2 }
  0xb6   :  { %v254_v10 = vadd.f32 %v253_v9, %v200_v5 }
  0xb8   :  { %v293_v14 = vadd.f32 %v292_v11, %v254_v10 }
  0xcb   :  { %v361_v15 = vpop.f32.mrf.mxu0 }
  0xcc   :  { %v362_v16 = vadd.f32 %v361_v15, %v293_v14 }
  0xd3   :  { %v398_v17 = vpop.f32.mrf.mxu1 }
  0xd4   :  { %v399_v19 = vadd.f32 %v398_v17, %v362_v16 }
  0xd6   :  { %v401_v20 = vmul.f32 0.25, %v399_v19 }
  0xd8   :  { %437 = vrsqrt.f32 %v401_v20  ;;  %vm408_vm1 = vweird.f32 %v401_v20 }
  0xde   :  { %v438_v21 = vpop.eup %437 }
  0xdf   :  { %v403_v22 = vmul.f32 %v438_v21, %v401_v20  ;;  %vm409_vm0 = vweird.f32 %v438_v21 }
  0xe0   :  { %vm410_vm2 = vmor %vm408_vm1, %vm409_vm0 }
  0xe1   :  { %v404_v23 = vmul.f32 %v438_v21, %v403_v22 }
  0xe3   :  { %v405_v24 = vmul.f32 0.5, %v404_v23 }
  0xe5   :  { %v406_v25 = vsub.f32 1.5, %v405_v24 }
  0xe7   :  { %v407_v27 = vmul.f32 %v438_v21, %v406_v25 }
  0xe9   :  { %v411_v28 = vsel %vm410_vm2, %v438_v21, %v407_v27 }
  0xea   :  { %v412_v29 = vmul.f32 %v411_v28, %v655_v61 }
  0xec   :  { %413 = vst [vmem:[#allocation7] sm:$0xff] %v412_v29 }
  0xed   :  { %424 = dma.vmem_to_hbm [thread:$0]  %s420_s1, 128, %s422_s23, [#allocation4]  }
  0xee   :  { %515 = dma.done.wait [#allocation4], 128  }
  0xef   :  { %516 = vsyncadd [#allocation4], 4294967168 }
  0xf0   :  { %429 = vsyncpa [#allocation3], 1 }
  0xf1   :  { %430 = vsyncpa [#allocation6], 1 }
  0xf2   :  { %431 = vsyncpa [#allocation4], 1 }

</bundles_post_ra>
